<compile_context>
chip_gen: v7x
topology: tpu7x:2x2x1
jax: 0.10.0
libtpu: 0.0.40
codegen_flags: <defaults>
</compile_context>

<pallas_src>
import functools

import jax
import jax.numpy as jnp
from jax import lax
from jax.experimental import pallas as pl
from jax.experimental.pallas import tpu as pltpu

COS_EPS = 1e-8     # torch.cosine_similarity eps
NORM_EPS = 1e-12   # torch.nn.functional.normalize eps


def _round_up(x, m):
    return ((x + m - 1) // m) * m


def _inv_l2(x, eps):
    # 1 / max(||x||_2, eps) per row == min(rsqrt(sum x^2), 1/eps); rsqrt(0)=inf clamps.
    return jnp.minimum(lax.rsqrt(jnp.sum(x * x, axis=-1, keepdims=True)), 1.0 / eps)


def _hinge_kernel(coarse_ref, fine_ref, scale_c_ref, scale_f_ref,
                  simpos_c_ref, simpos_f_ref,
                  neg_c_ref, neg_f_ref, invn_c_ref, invn_f_ref,
                  out_c_ref, out_f_ref,
                  *, margin_coarse, margin_fine,
                  n_neg_c, n_neg_f, tiles_c, tiles_f, num_tiles,
                  batch, tile_n):
    k = pl.program_id(0)

    @pl.when(k == 0)
    def _init():
        out_c_ref[...] = jnp.zeros_like(out_c_ref)
        out_f_ref[...] = jnp.zeros_like(out_f_ref)

    # Global lane index of each negative in this tile (masks padded/ragged tail).
    col = lax.broadcasted_iota(jnp.int32, (batch, tile_n), 1) + k * tile_n

    def accumulate(feat_ref, scale_ref, simpos_ref, neg_ref, invn_ref,
                   out_ref, margin, n_valid):
        # bf16 MXU operands straight from the DMA'd tile; f32 accumulation.
        dots = lax.dot_general(feat_ref[...], neg_ref[...],
                               (((1,), (1,)), ((), ())),
                               preferred_element_type=jnp.float32)      # [B, TN]
        # Row scale = 1/(||feat|| * T); column scale = 1/||neg|| (precomputed).
        sim_neg = dots * scale_ref[...] * invn_ref[...]
        hinge = jnp.maximum(sim_neg - simpos_ref[...] + margin, 0.0)
        hinge = jnp.where(col < n_valid, hinge, 0.0)
        # Fold over 128-lane groups with plain VPU adds; the single cross-lane
        # reduce over the [B, 128] accumulator happens in the wrapper.
        acc = hinge[:, 0:128]
        for g in range(1, tile_n // 128):
            acc = acc + hinge[:, g * 128:(g + 1) * 128]
        out_ref[...] += acc

    def coarse_branch():
        accumulate(coarse_ref, scale_c_ref, simpos_c_ref, neg_c_ref,
                   invn_c_ref, out_c_ref, margin_coarse, n_neg_c)

    def fine_branch():
        accumulate(fine_ref, scale_f_ref, simpos_f_ref, neg_f_ref,
                   invn_f_ref, out_f_ref, margin_fine, n_neg_f)

    # Skip compute once a bank's own tile range is exhausted (its index_map is
    # clamped to its last block, so no extra DMA is issued either).
    if tiles_c == num_tiles:
        coarse_branch()
    else:
        pl.when(k < tiles_c)(coarse_branch)
    if tiles_f == num_tiles:
        fine_branch()
    else:
        pl.when(k < tiles_f)(fine_branch)


def multi_granular_contrastive_loss(coarse_feat, fine_feat,
                                    protos_coarse, protos_fine,
                                    label_indices,
                                    neg_coarse, neg_fine,
                                    margins=(0.5, 1.0), temperature=0.5,
                                    tile_n=1024):
    """JAX wrapper. Tiny per-row stats / gather / epilogue in plain JAX (fused by
    XLA); the bandwidth-bound negative-bank streaming + hinge sums in Pallas.

    `protos_*` are stacked in sorted-class order; `label_indices` already maps
    each label to its row (mirrors `classes.index(l.item())` in the torch code).
    """
    B, D = coarse_feat.shape
    n_neg_c = 0 if neg_coarse is None else int(neg_coarse.shape[0])
    n_neg_f = 0 if neg_fine is None else int(neg_fine.shape[0])

    # torch returns a 0.0 loss for an empty bank; use a fully-masked dummy row.
    if n_neg_c == 0:
        neg_coarse = jnp.zeros((1, D), coarse_feat.dtype)
    if n_neg_f == 0:
        neg_fine = jnp.zeros((1, D), fine_feat.dtype)

    cf = coarse_feat.astype(jnp.float32)
    ff = fine_feat.astype(jnp.float32)

    # torch: pos_protos = global_protos_tensor[label_indices]
    pos_c = jnp.take(protos_coarse, label_indices, axis=0).astype(jnp.float32)
    pos_f = jnp.take(protos_fine, label_indices, axis=0).astype(jnp.float32)

    # Grid-invariant per-row stats (hoisted out of the kernel body).
    # Note: norms clamped per-vector at eps (not the product) -> not bit-identical
    # to torch.cosine_similarity for near-zero-norm rows.
    inv_temp = 1.0 / float(temperature)
    scale_c = _inv_l2(cf, COS_EPS) * inv_temp                       # [B, 1]
    scale_f = _inv_l2(ff, COS_EPS) * inv_temp
    simpos_c = jnp.sum(cf * pos_c, -1, keepdims=True) * scale_c * _inv_l2(pos_c, COS_EPS)
    simpos_f = jnp.sum(ff * pos_f, -1, keepdims=True) * scale_f * _inv_l2(pos_f, COS_EPS)

    # Per-negative inverse norms, lane-dense [1, N] (column scale in the kernel).
    invn_c = _inv_l2(neg_coarse.astype(jnp.float32), COS_EPS).reshape(1, -1)
    invn_f = _inv_l2(neg_fine.astype(jnp.float32), COS_EPS).reshape(1, -1)

    # bf16 streamed banks + bf16 MXU operands (halves HBM bytes; f32 accumulate).
    neg_c_bf = neg_coarse.astype(jnp.bfloat16)
    neg_f_bf = neg_fine.astype(jnp.bfloat16)
    cf_bf = cf.astype(jnp.bfloat16)
    ff_bf = ff.astype(jnp.bfloat16)

    # Tile / pad each bank independently to its own multiple of tn (no common max).
    eff_c = max(n_neg_c, 1)
    eff_f = max(n_neg_f, 1)
    max_n = max(eff_c, eff_f)
    tn = _round_up(min(int(tile_n), _round_up(max_n, 256)), 256)
    pad_c = _round_up(eff_c, tn)
    pad_f = _round_up(eff_f, tn)
    tiles_c = pad_c // tn
    tiles_f = pad_f // tn
    num_tiles = max(tiles_c, tiles_f)

    neg_c_p = jnp.pad(neg_c_bf, ((0, pad_c - eff_c), (0, 0)))
    neg_f_p = jnp.pad(neg_f_bf, ((0, pad_f - eff_f), (0, 0)))
    invn_c_p = jnp.pad(invn_c, ((0, 0), (0, pad_c - eff_c)))
    invn_f_p = jnp.pad(invn_f, ((0, 0), (0, pad_f - eff_f)))

    kernel = functools.partial(
        _hinge_kernel,
        margin_coarse=float(margins[0]), margin_fine=float(margins[1]),
        n_neg_c=n_neg_c, n_neg_f=n_neg_f,
        tiles_c=tiles_c, tiles_f=tiles_f, num_tiles=num_tiles,
        batch=int(B), tile_n=int(tn))

    itemsize = 2  # bf16 banks dominate traffic
    cost = pl.CostEstimate(
        flops=int(2 * B * D * (pad_c + pad_f) + 6 * B * (pad_c + pad_f)),
        transcendentals=0,
        bytes_accessed=int(itemsize * D * (pad_c + pad_f)
                           + 4 * (pad_c + pad_f)
                           + itemsize * 2 * B * D + 4 * 2 * B * 128))

    res_map = lambda k: (0, 0)
    acc_c, acc_f = pl.pallas_call(
        kernel,
        out_shape=(jax.ShapeDtypeStruct((B, 128), jnp.float32),
                   jax.ShapeDtypeStruct((B, 128), jnp.float32)),
        grid=(num_tiles,),
        in_specs=[
            pl.BlockSpec((B, D), res_map),              # coarse feat (resident, bf16)
            pl.BlockSpec((B, D), res_map),              # fine feat
            pl.BlockSpec((B, 1), res_map),              # row scale (coarse)
            pl.BlockSpec((B, 1), res_map),              # row scale (fine)
            pl.BlockSpec((B, 1), res_map),              # sim_pos (coarse)
            pl.BlockSpec((B, 1), res_map),              # sim_pos (fine)
            pl.BlockSpec((tn, D), lambda k: (jnp.minimum(k, tiles_c - 1), 0)),  # neg tile c
            pl.BlockSpec((tn, D), lambda k: (jnp.minimum(k, tiles_f - 1), 0)),  # neg tile f
            pl.BlockSpec((1, tn), lambda k: (0, jnp.minimum(k, tiles_c - 1))),  # 1/||neg_c||
            pl.BlockSpec((1, tn), lambda k: (0, jnp.minimum(k, tiles_f - 1))),  # 1/||neg_f||
        ],
        out_specs=(pl.BlockSpec((B, 128), res_map),     # coarse hinge partials
                   pl.BlockSpec((B, 128), res_map)),    # fine hinge partials
        compiler_params=pltpu.CompilerParams(
            dimension_semantics=("arbitrary",),
            vmem_limit_bytes=32 * 1024 * 1024),
        cost_estimate=cost,
    )(cf_bf, ff_bf, scale_c, scale_f, simpos_c, simpos_f,
      neg_c_p, neg_f_p, invn_c_p, invn_f_p)

    # Epilogue in the wrapper (tiny; fused by XLA): mean scaling + ortho term.
    loss_c = jnp.sum(acc_c) / float(B * eff_c)
    loss_f = jnp.sum(acc_f) / float(B * eff_f)

    # ||n1.T @ n2||_F^2 == sum((n1 @ n1.T) * (n2 @ n2.T)) -> two tiny [B,B] Grams.
    n1 = cf * _inv_l2(cf, NORM_EPS)
    n2 = ff * _inv_l2(ff, NORM_EPS)
    g1 = jnp.dot(n1, n1.T)
    g2 = jnp.dot(n2, n2.T)
    ortho = jnp.sqrt(jnp.maximum(jnp.sum(g1 * g2), 0.0))

    return loss_c + 0.5 * loss_f + 0.1 * ortho


if __name__ == "__main__":
    key = jax.random.PRNGKey(0)
    kc, kf, kpc, kpf, knc, knf, kl = jax.random.split(key, 7)

    B, D, C, N = 8, 128, 4, 32          # batch, feat dim, num classes, negatives

    coarse_feat = jax.random.normal(kc, (B, D), jnp.float32)
    fine_feat = jax.random.normal(kf, (B, D), jnp.float32)
    protos_coarse = jax.random.normal(kpc, (C, D), jnp.float32)
    protos_fine = jax.random.normal(kpf, (C, D), jnp.float32)
    labels = jax.random.randint(kl, (B,), 0, C)
    neg_coarse = jax.random.normal(knc, (N, D), jnp.float32)
    neg_fine = jax.random.normal(knf, (N, D), jnp.float32)

    loss = multi_granular_contrastive_loss(
        coarse_feat, fine_feat, protos_coarse, protos_fine, labels,
        neg_coarse, neg_fine, margins=(0.5, 1.0), temperature=0.5)
    jax.block_until_ready(loss)
    print("KERNEL_OK")
</pallas_src>

<mosaic_0001>
module attributes {stable_mosaic.version = 11 : i64} {
  func.func @_hinge_kernel(%arg0: i32, %arg1: memref<8x128xbf16, #tpu.memory_space<vmem>>, %arg2: memref<8x128xbf16, #tpu.memory_space<vmem>>, %arg3: memref<8x1xf32, #tpu.memory_space<vmem>>, %arg4: memref<8x1xf32, #tpu.memory_space<vmem>>, %arg5: memref<8x1xf32, #tpu.memory_space<vmem>>, %arg6: memref<8x1xf32, #tpu.memory_space<vmem>>, %arg7: memref<256x128xbf16, #tpu.memory_space<vmem>>, %arg8: memref<256x128xbf16, #tpu.memory_space<vmem>>, %arg9: memref<1x256xf32, #tpu.memory_space<vmem>>, %arg10: memref<1x256xf32, #tpu.memory_space<vmem>>, %arg11: memref<8x128xf32, #tpu.memory_space<vmem>>, %arg12: memref<8x128xf32, #tpu.memory_space<vmem>>) attributes {dimension_semantics = [#tpu.dimension_semantics<arbitrary>], iteration_bounds = array<i64: 1>, scalar_prefetch = 0 : i64, scratch_operands = 0 : i64, tpu.core_type = #tpu.core_type<tc>, window_params = [{pipeline_mode = #tpu.pipeline_mode<synchronous>, transform_indices = @transform_0, window_bounds = array<i64: 8, 128>}, {pipeline_mode = #tpu.pipeline_mode<synchronous>, transform_indices = @transform_1, window_bounds = array<i64: 8, 128>}, {pipeline_mode = #tpu.pipeline_mode<synchronous>, transform_indices = @transform_2, window_bounds = array<i64: 8, 1>}, {pipeline_mode = #tpu.pipeline_mode<synchronous>, transform_indices = @transform_3, window_bounds = array<i64: 8, 1>}, {pipeline_mode = #tpu.pipeline_mode<synchronous>, transform_indices = @transform_4, window_bounds = array<i64: 8, 1>}, {pipeline_mode = #tpu.pipeline_mode<synchronous>, transform_indices = @transform_5, window_bounds = array<i64: 8, 1>}, {transform_indices = @transform_6, window_bounds = array<i64: 256, 128>}, {transform_indices = @transform_7, window_bounds = array<i64: 256, 128>}, {transform_indices = @transform_8, window_bounds = array<i64: 1, 256>}, {transform_indices = @transform_9, window_bounds = array<i64: 1, 256>}, {pipeline_mode = #tpu.pipeline_mode<synchronous>, transform_indices = @transform_10, window_bounds = array<i64: 8, 128>}, {pipeline_mode = #tpu.pipeline_mode<synchronous>, transform_indices = @transform_11, window_bounds = array<i64: 8, 128>}]} {
    %c0_i32 = arith.constant 0 : i32
    %0 = arith.cmpi eq, %arg0, %c0_i32 : i32
    %1 = arith.extui %0 : i1 to i32
    %c0_i32_0 = arith.constant 0 : i32
    %2 = arith.cmpi ne, %1, %c0_i32_0 : i32
    scf.if %2 {
      %cst_36 = arith.constant 0.000000e+00 : f32
      %59 = vector.broadcast %cst_36 : f32 to vector<8x128xf32>
      %c0_37 = arith.constant 0 : index
      %c0_38 = arith.constant 0 : index
      %60 = vector.load %arg11[%c0_37, %c0_38] : memref<8x128xf32, #tpu.memory_space<vmem>>, vector<8x128xf32>
      tpu.vector_store %arg11[%c0_37, %c0_38], %59 {strides = array<i32>} : memref<8x128xf32, #tpu.memory_space<vmem>>, vector<8x128xf32>,
      %cst_39 = arith.constant 0.000000e+00 : f32
      %61 = vector.broadcast %cst_39 : f32 to vector<8x128xf32>
      %c0_40 = arith.constant 0 : index
      %c0_41 = arith.constant 0 : index
      %62 = vector.load %arg12[%c0_40, %c0_41] : memref<8x128xf32, #tpu.memory_space<vmem>>, vector<8x128xf32>
      tpu.vector_store %arg12[%c0_40, %c0_41], %61 {strides = array<i32>} : memref<8x128xf32, #tpu.memory_space<vmem>>, vector<8x128xf32>,
    } else {
    }
    %3 = tpu.iota {dimensions = array<i32: 1>} : vector<8x256xi32>
    %c256_i32 = arith.constant 256 : i32
    %4 = arith.muli %arg0, %c256_i32 : i32
    %5 = vector.broadcast %4 : i32 to vector<8x256xi32>
    %6 = arith.addi %3, %5 : vector<8x256xi32>
    %c0 = arith.constant 0 : index
    %c0_1 = arith.constant 0 : index
    %7 = vector.load %arg1[%c0, %c0_1] : memref<8x128xbf16, #tpu.memory_space<vmem>>, vector<8x128xbf16>
    %c0_2 = arith.constant 0 : index
    %c0_3 = arith.constant 0 : index
    %8 = vector.load %arg7[%c0_2, %c0_3] : memref<256x128xbf16, #tpu.memory_space<vmem>>, vector<256x128xbf16>
    %cst = arith.constant dense<0.000000e+00> : vector<8x256xf32>
    %9 = tpu.matmul %7, %8, %cst {dimension_numbers = #tpu.dot_dimension_numbers<[1], [1], [0], [0], [0, 0, 1, 0], [], []>} : vector<8x128xbf16>, vector<256x128xbf16>, vector<8x256xf32> -> vector<8x256xf32>
    %c0_4 = arith.constant 0 : index
    %c0_5 = arith.constant 0 : index
    %10 = vector.load %arg3[%c0_4, %c0_5] : memref<8x1xf32, #tpu.memory_space<vmem>>, vector<8x1xf32>
    %11 = vector.broadcast %10 : vector<8x1xf32> to vector<8x256xf32>
    %12 = arith.mulf %9, %11 : vector<8x256xf32>
    %c0_6 = arith.constant 0 : index
    %c0_7 = arith.constant 0 : index
    %13 = vector.load %arg9[%c0_6, %c0_7] : memref<1x256xf32, #tpu.memory_space<vmem>>, vector<1x256xf32>
    %14 = vector.broadcast %13 : vector<1x256xf32> to vector<8x256xf32>
    %15 = arith.mulf %12, %14 : vector<8x256xf32>
    %c0_8 = arith.constant 0 : index
    %c0_9 = arith.constant 0 : index
    %16 = vector.load %arg5[%c0_8, %c0_9] : memref<8x1xf32, #tpu.memory_space<vmem>>, vector<8x1xf32>
    %17 = vector.broadcast %16 : vector<8x1xf32> to vector<8x256xf32>
    %18 = arith.subf %15, %17 : vector<8x256xf32>
    %cst_10 = arith.constant 5.000000e-01 : f32
    %19 = vector.broadcast %cst_10 : f32 to vector<8x256xf32>
    %20 = arith.addf %18, %19 : vector<8x256xf32>
    %cst_11 = arith.constant 0.000000e+00 : f32
    %21 = vector.broadcast %cst_11 : f32 to vector<8x256xf32>
    %22 = arith.maximumf %20, %21 : vector<8x256xf32>
    %c32_i32 = arith.constant 32 : i32
    %23 = vector.broadcast %c32_i32 : i32 to vector<8x256xi32>
    %24 = arith.cmpi slt, %6, %23 : vector<8x256xi32>
    %cst_12 = arith.constant 0.000000e+00 : f32
    %25 = vector.broadcast %cst_12 : f32 to vector<8x256xf32>
    %26 = arith.select %24, %22, %25 : vector<8x256xi1>, vector<8x256xf32>
    %27 = vector.extract_strided_slice %26 {offsets = [0, 0], sizes = [8, 128], strides = [1, 1]} : vector<8x256xf32> to vector<8x128xf32>
    %28 = vector.extract_strided_slice %26 {offsets = [0, 128], sizes = [8, 128], strides = [1, 1]} : vector<8x256xf32> to vector<8x128xf32>
    %29 = arith.addf %27, %28 : vector<8x128xf32>
    %c0_13 = arith.constant 0 : index
    %c0_14 = arith.constant 0 : index
    %30 = vector.load %arg11[%c0_13, %c0_14] : memref<8x128xf32, #tpu.memory_space<vmem>>, vector<8x128xf32>
    %31 = arith.addf %30, %29 : vector<8x128xf32>
    %c0_15 = arith.constant 0 : index
    %c0_16 = arith.constant 0 : index
    %32 = vector.load %arg11[%c0_15, %c0_16] : memref<8x128xf32, #tpu.memory_space<vmem>>, vector<8x128xf32>
    tpu.vector_store %arg11[%c0_15, %c0_16], %31 {strides = array<i32>} : memref<8x128xf32, #tpu.memory_space<vmem>>, vector<8x128xf32>,
    %c0_17 = arith.constant 0 : index
    %c0_18 = arith.constant 0 : index
    %33 = vector.load %arg2[%c0_17, %c0_18] : memref<8x128xbf16, #tpu.memory_space<vmem>>, vector<8x128xbf16>
    %c0_19 = arith.constant 0 : index
    %c0_20 = arith.constant 0 : index
    %34 = vector.load %arg8[%c0_19, %c0_20] : memref<256x128xbf16, #tpu.memory_space<vmem>>, vector<256x128xbf16>
    %cst_21 = arith.constant dense<0.000000e+00> : vector<8x256xf32>
    %35 = tpu.matmul %33, %34, %cst_21 {dimension_numbers = #tpu.dot_dimension_numbers<[1], [1], [0], [0], [0, 0, 1, 0], [], []>} : vector<8x128xbf16>, vector<256x128xbf16>, vector<8x256xf32> -> vector<8x256xf32>
    %c0_22 = arith.constant 0 : index
    %c0_23 = arith.constant 0 : index
    %36 = vector.load %arg4[%c0_22, %c0_23] : memref<8x1xf32, #tpu.memory_space<vmem>>, vector<8x1xf32>
    %37 = vector.broadcast %36 : vector<8x1xf32> to vector<8x256xf32>
    %38 = arith.mulf %35, %37 : vector<8x256xf32>
    %c0_24 = arith.constant 0 : index
    %c0_25 = arith.constant 0 : index
    %39 = vector.load %arg10[%c0_24, %c0_25] : memref<1x256xf32, #tpu.memory_space<vmem>>, vector<1x256xf32>
    %40 = vector.broadcast %39 : vector<1x256xf32> to vector<8x256xf32>
    %41 = arith.mulf %38, %40 : vector<8x256xf32>
    %c0_26 = arith.constant 0 : index
    %c0_27 = arith.constant 0 : index
    %42 = vector.load %arg6[%c0_26, %c0_27] : memref<8x1xf32, #tpu.memory_space<vmem>>, vector<8x1xf32>
    %43 = vector.broadcast %42 : vector<8x1xf32> to vector<8x256xf32>
    %44 = arith.subf %41, %43 : vector<8x256xf32>
    %cst_28 = arith.constant 1.000000e+00 : f32
    %45 = vector.broadcast %cst_28 : f32 to vector<8x256xf32>
    %46 = arith.addf %44, %45 : vector<8x256xf32>
    %cst_29 = arith.constant 0.000000e+00 : f32
    %47 = vector.broadcast %cst_29 : f32 to vector<8x256xf32>
    %48 = arith.maximumf %46, %47 : vector<8x256xf32>
    %c32_i32_30 = arith.constant 32 : i32
    %49 = vector.broadcast %c32_i32_30 : i32 to vector<8x256xi32>
    %50 = arith.cmpi slt, %6, %49 : vector<8x256xi32>
    %cst_31 = arith.constant 0.000000e+00 : f32
    %51 = vector.broadcast %cst_31 : f32 to vector<8x256xf32>
    %52 = arith.select %50, %48, %51 : vector<8x256xi1>, vector<8x256xf32>
    %53 = vector.extract_strided_slice %52 {offsets = [0, 0], sizes = [8, 128], strides = [1, 1]} : vector<8x256xf32> to vector<8x128xf32>
    %54 = vector.extract_strided_slice %52 {offsets = [0, 128], sizes = [8, 128], strides = [1, 1]} : vector<8x256xf32> to vector<8x128xf32>
    %55 = arith.addf %53, %54 : vector<8x128xf32>
    %c0_32 = arith.constant 0 : index
    %c0_33 = arith.constant 0 : index
    %56 = vector.load %arg12[%c0_32, %c0_33] : memref<8x128xf32, #tpu.memory_space<vmem>>, vector<8x128xf32>
    %57 = arith.addf %56, %55 : vector<8x128xf32>
    %c0_34 = arith.constant 0 : index
    %c0_35 = arith.constant 0 : index
    %58 = vector.load %arg12[%c0_34, %c0_35] : memref<8x128xf32, #tpu.memory_space<vmem>>, vector<8x128xf32>
    tpu.vector_store %arg12[%c0_34, %c0_35], %57 {strides = array<i32>} : memref<8x128xf32, #tpu.memory_space<vmem>>, vector<8x128xf32>,
    return
  }
  func.func @transform_0(%arg0: i32) -> (i32, i32) {
    %c0_i32 = arith.constant 0 : i32
    %c0_i32_0 = arith.constant 0 : i32
    %c0_i32_1 = arith.constant 0 : i32
    return %c0_i32, %c0_i32_0 : i32, i32
  }
  func.func @transform_1(%arg0: i32) -> (i32, i32) {
    %c0_i32 = arith.constant 0 : i32
    %c0_i32_0 = arith.constant 0 : i32
    %c0_i32_1 = arith.constant 0 : i32
    return %c0_i32, %c0_i32_0 : i32, i32
  }
  func.func @transform_2(%arg0: i32) -> (i32, i32) {
    %c0_i32 = arith.constant 0 : i32
    %c0_i32_0 = arith.constant 0 : i32
    %c0_i32_1 = arith.constant 0 : i32
    return %c0_i32, %c0_i32_0 : i32, i32
  }
  func.func @transform_3(%arg0: i32) -> (i32, i32) {
    %c0_i32 = arith.constant 0 : i32
    %c0_i32_0 = arith.constant 0 : i32
    %c0_i32_1 = arith.constant 0 : i32
    return %c0_i32, %c0_i32_0 : i32, i32
  }
  func.func @transform_4(%arg0: i32) -> (i32, i32) {
    %c0_i32 = arith.constant 0 : i32
    %c0_i32_0 = arith.constant 0 : i32
    %c0_i32_1 = arith.constant 0 : i32
    return %c0_i32, %c0_i32_0 : i32, i32
  }
  func.func @transform_5(%arg0: i32) -> (i32, i32) {
    %c0_i32 = arith.constant 0 : i32
    %c0_i32_0 = arith.constant 0 : i32
    %c0_i32_1 = arith.constant 0 : i32
    return %c0_i32, %c0_i32_0 : i32, i32
  }
  func.func @transform_6(%arg0: i32) -> (i32, i32) {
    %c0_i32 = arith.constant 0 : i32
    %0 = arith.minsi %arg0, %c0_i32 : i32
    %c0_i32_0 = arith.constant 0 : i32
    %c0_i32_1 = arith.constant 0 : i32
    return %0, %c0_i32_0 : i32, i32
  }
  func.func @transform_7(%arg0: i32) -> (i32, i32) {
    %c0_i32 = arith.constant 0 : i32
    %0 = arith.minsi %arg0, %c0_i32 : i32
    %c0_i32_0 = arith.constant 0 : i32
    %c0_i32_1 = arith.constant 0 : i32
    return %0, %c0_i32_0 : i32, i32
  }
  func.func @transform_8(%arg0: i32) -> (i32, i32) {
    %c0_i32 = arith.constant 0 : i32
    %0 = arith.minsi %arg0, %c0_i32 : i32
    %c0_i32_0 = arith.constant 0 : i32
    %c0_i32_1 = arith.constant 0 : i32
    return %c0_i32_0, %0 : i32, i32
  }
  func.func @transform_9(%arg0: i32) -> (i32, i32) {
    %c0_i32 = arith.constant 0 : i32
    %0 = arith.minsi %arg0, %c0_i32 : i32
    %c0_i32_0 = arith.constant 0 : i32
    %c0_i32_1 = arith.constant 0 : i32
    return %c0_i32_0, %0 : i32, i32
  }
  func.func @transform_10(%arg0: i32) -> (i32, i32) {
    %c0_i32 = arith.constant 0 : i32
    %c0_i32_0 = arith.constant 0 : i32
    %c0_i32_1 = arith.constant 0 : i32
    return %c0_i32, %c0_i32_0 : i32, i32
  }
  func.func @transform_11(%arg0: i32) -> (i32, i32) {
    %c0_i32 = arith.constant 0 : i32
    %c0_i32_0 = arith.constant 0 : i32
    %c0_i32_1 = arith.constant 0 : i32
    return %c0_i32, %c0_i32_0 : i32, i32
  }
}

</mosaic_0001>

<bundles_post_ra>
// kernel: tpu_custom_call.1
= control target key start
LH: loop header
LB: loop body
LE: loop exit
PB: predicated region body
PF: predicated region fallthrough
CT: control target
= control target key end

     0   :  { %17 = vsyncpa [#allocation3], 0  ;;  %s878_s0 = inlined_call_operand.vmem [shape: bf16[8,128], index: 0, kind: input, shape index: {}]   ;;  %s879_s1 = inlined_call_operand.vmem [shape: bf16[8,128], index: 1, kind: input, shape index: {}]   ;;  %s880_s2 = inlined_call_operand.vmem [shape: f32[8,1], index: 2, kind: input, shape index: {}]   ;;  %s881_s3 = inlined_call_operand.vmem [shape: f32[8,1], index: 3, kind: input, shape index: {}]   ;;  %s882_s4 = inlined_call_operand.vmem [shape: f32[8,1], index: 4, kind: input, shape index: {}]   ;;  %s883_s5 = inlined_call_operand.vmem [shape: f32[8,1], index: 5, kind: input, shape index: {}]   ;;  %s884_s6 = inlined_call_operand.hbm [shape: bf16[256,128], index: 6, kind: input, shape index: {}]   ;;  %s885_s7 = inlined_call_operand.hbm [shape: bf16[256,128], index: 7, kind: input, shape index: {}]   ;;  %s886_s8 = inlined_call_operand.vmem [shape: f32[1,256], index: 8, kind: input, shape index: {}]   ;;  %s887_s9 = inlined_call_operand.vmem [shape: f32[1,256], index: 9, kind: input, shape index: {}]   ;;  %s888_s10 = inlined_call_operand.hbm [shape: f32[8,128], index: 10, kind: output, shape index: {0}]   ;;  %s889_s11 = inlined_call_operand.hbm [shape: f32[8,128], index: 11, kind: output, shape index: {1}]  }
   0x1   :  { %18 = vsyncpa [#allocation6], 0 }
   0x2   :  { %19 = vsyncpa [#allocation4], 0 }
   0x3   :  { %20 = vsyncpa [#allocation9], 0  ;;  %s739_s17 = smov [#allocation2]   ;;  %s643_s21 = scalar_lea.hbm %s884_s6, 2048 }
   0x4   :  { %s38_s18 = sshll.u32 %s739_s17, 4  ;;  %p644_p0 = scmp.ne.s32.totalorder %s884_s6, %s643_s21  ;;  %s39_s18 = int_to_ptr.vmem [resolvable:$true] %s38_s18 }
   0x5   :  { %p647_p1 = scmp.lt.u32.totalorder %s643_s21, %s884_s6 }
   0x7   :  { %p649_p2 = pnand %p647_p1, %p644_p0 }
   0x9   :  { %652 = shalt.err (!%p649_p2)
}
   0xa   :  { %s653_s26 = scalar_lea.vmem %s39_s18, 2048  ;;  %p658_p4 = scmp.lt.s32.totalorder %s39_s18, %s39_s18 }
   0xb   :  { %p654_p3 = scmp.ne.s32.totalorder %s39_s18, %s653_s26  ;;  %p659_p5 = scmp.lt.s32.totalorder %s653_s26, %s653_s26 }
   0xd   :  { %p660_p6 = por %p659_p5, %p658_p4 }
   0xf   :  { %p661_p7 = pnand %p660_p6, %p654_p3 }
  0x11   :  { %664 = shalt.err (!%p661_p7)
}
  0x12   :  { %s740_s27 = smov 64   ;;  %s741_s28 = smov 4  }
  0x13   :  { %44 = dma.hbm_to_vmem [thread:$0]  %s884_s6, 2048, %s39_s18, [#allocation3], %s740_s27, %s740_s27, %s741_s28  }
  0x14   :  { %s742_s12 = smov [#allocation5]   ;;  %s665_s16 = scalar_lea.hbm %s885_s7, 2048 }
  0x15   :  { %s50_s13 = sshll.u32 %s742_s12, 4  ;;  %p666_p8 = scmp.ne.s32.totalorder %s885_s7, %s665_s16  ;;  %s51_s13 = int_to_ptr.vmem [resolvable:$true] %s50_s13 }
  0x16   :  { %p669_p9 = scmp.lt.u32.totalorder %s665_s16, %s885_s7 }
  0x18   :  { %p671_p10 = pnand %p669_p9, %p666_p8 }
  0x1a   :  { %674 = shalt.err (!%p671_p10)
}
  0x1b   :  { %s675_s22 = scalar_lea.vmem %s51_s13, 2048  ;;  %p680_p12 = scmp.lt.s32.totalorder %s51_s13, %s51_s13 }
  0x1c   :  { %p676_p11 = scmp.ne.s32.totalorder %s51_s13, %s675_s22  ;;  %p681_p13 = scmp.lt.s32.totalorder %s675_s22, %s675_s22 }
  0x1e   :  { %p682_p0 = por %p681_p13, %p680_p12 }
  0x20   :  { %p683_p1 = pnand %p682_p0, %p676_p11 }
  0x22   :  { %686 = shalt.err (!%p683_p1)
}
  0x23   :  { %56 = dma.hbm_to_vmem [thread:$0]  %s885_s7, 2048, %s51_s13, [#allocation6], %s740_s27, %s740_s27, %s741_s28  }
  0x24   :  { %731 = dma.done.wait [#allocation3], 2048  }
  0x25   :  { %732 = vsyncadd [#allocation3], 4294965248 }
  0x26   :  { %733 = dma.done.wait [#allocation6], 2048  }
  0x27   :  { %734 = vsyncadd [#allocation6], 4294965248  ;;  %v743_v0 = vmov 0   ;;  %v611_v1 = vld [vmem:[#allocation2 + $0x40] sm:$0xff]   ;;  %v615_v5 = vld [vmem:[#allocation2 + $0x48] sm:$0xff]   ;;  %v74_v39 = vlaneseq  ;;  %s745_s13 = smov [#allocation8]  }
  0x28   :  { %609 = vset.pattern.permute.xlu0 %v743_v0  ;;  %610 = vset.pattern.permute.xlu1 %v743_v0  ;;  %v612_v2 = vld [vmem:[#allocation5 + $0x40] sm:$0xff]   ;;  %v616_v6 = vld [vmem:[#allocation5 + $0x48] sm:$0xff]   ;;  %v619_v9 = vld [vmem:[#allocation2 + $0x50] sm:$0xff]   ;;  %s519_s14 = sshll.u32 %s745_s13, 4  ;;  %s520_s14 = int_to_ptr.vmem [resolvable:$true] %s519_s14 }
  0x29   :  { %565 = vmatprep.subr.bf16.mxu0 %v611_v1  ;;  %v613_v3 = vld [vmem:[#allocation2] sm:$0xff]   ;;  %583 = vmatprep.subr.bf16.mxu1 %v612_v2  ;;  %v617_v7 = vld [vmem:[#allocation2 + $0x8] sm:$0xff]   ;;  %v620_v10 = vld [vmem:[#allocation5 + $0x50] sm:$0xff]   ;;  %v262_v40 = vshrl.u32 %v74_v39, 7  ;;  %v75_v59 = vand.u32 127, %v74_v39 }
  0x2a   :  { %v614_v4 = vld [vmem:[#allocation5] sm:$0xff]   ;;  %566 = vmatpush3.bf16.xpose.msra.mxu0 %v613_v3  ;;  %v618_v8 = vld [vmem:[#allocation5 + $0x8] sm:$0xff]   ;;  %v621_v11 = vld [vmem:[#allocation2 + $0x10] sm:$0xff]  }
  0x2b   :  { %584 = vmatpush3.bf16.xpose.msra.mxu1 %v614_v4  ;;  %567 = vmatprep.subr.bf16.mxu0 %v615_v5  ;;  %v622_v12 = vld [vmem:[#allocation5 + $0x10] sm:$0xff]   ;;  %v623_v13 = vld [vmem:[#allocation2 + $0x58] sm:$0xff]   ;;  %v627_v17 = vld [vmem:[#allocation2 + $0x60] sm:$0xff]   ;;  %v263_v42 = vsub.s32 0, %v262_v40  ;;  %vm285_vm0 = vcmp.lt.s32.totalorder %v75_v59, 32 }
  0x2c   :  { %585 = vmatprep.subr.bf16.mxu1 %v616_v6  ;;  %v624_v14 = vld [vmem:[#allocation5 + $0x58] sm:$0xff]   ;;  %v628_v18 = vld [vmem:[#allocation5 + $0x60] sm:$0xff]   ;;  %v631_v24 = vld [vmem:[#allocation2 + $0x68] sm:$0xff]  }
  0x2d   :  { %v625_v15 = vld [vmem:[#allocation2 + $0x18] sm:$0xff]   ;;  %v629_v19 = vld [vmem:[#allocation2 + $0x20] sm:$0xff]   ;;  %v632_v26 = vld [vmem:[#allocation5 + $0x68] sm:$0xff]  }
  0x2e   :  { %v626_v16 = vld [vmem:[#allocation5 + $0x18] sm:$0xff]   ;;  %v81_v20 = vld [vmem:[%s878_s0] sm:$0xf]  ;;  %v633_v29 = vld [vmem:[#allocation2 + $0x28] sm:$0xff]  }
  0x2f   :  { %v293_v21 = vld [vmem:[%s879_s1] sm:$0xf]  ;;  %581 = vmatprep.mubr.bf16.mxu0 %v81_v20  ;;  %v634_v30 = vld [vmem:[#allocation5 + $0x28] sm:$0xff]   ;;  %v635_v31 = vld [vmem:[#allocation2 + $0x70] sm:$0xff]  }
  0x30   :  { %v251_v22 = vld [vmem:[%s880_s2] sm:$0xff]  ;;  %599 = vmatprep.mubr.bf16.mxu1 %v293_v21  ;;  %v636_v32 = vld [vmem:[#allocation5 + $0x70] sm:$0xff]   ;;  %v639_v35 = vld [vmem:[#allocation2 + $0x78] sm:$0xff]  }
  0x31   :  { %v630_v23 = vld [vmem:[#allocation5 + $0x20] sm:$0xff]   ;;  %254 = vperm.xlu0 %609, %v251_v22   ;;  %v637_v33 = vld [vmem:[#allocation2 + $0x30] sm:$0xff]   ;;  %v640_v36 = vld [vmem:[#allocation5 + $0x78] sm:$0xff]  }
  0x32   :  { %568 = vmatpush3.bf16.xpose.msra.mxu0 %v617_v7  ;;  %v273_v25 = vld [vmem:[%s882_s4] sm:$0xff]  ;;  %v638_v34 = vld [vmem:[#allocation5 + $0x30] sm:$0xff]   ;;  %v641_v37 = vld [vmem:[#allocation2 + $0x38] sm:$0xff]  }
  0x33   :  { %586 = vmatpush3.bf16.xpose.msra.mxu1 %v618_v8  ;;  %569 = vmatprep.subr.bf16.mxu0 %v619_v9  ;;  %v463_v27 = vld [vmem:[%s881_s3] sm:$0xff]  ;;  %v642_v38 = vld [vmem:[#allocation5 + $0x38] sm:$0xff]  }
  0x34   :  { %587 = vmatprep.subr.bf16.mxu1 %v620_v10  ;;  %276 = vperm.xlu1 %610, %v273_v25   ;;  %v485_v28 = vld [vmem:[%s883_s5] sm:$0xff] }
  0x35   :  { %466 = vperm.xlu0 %609, %v463_v27   ;;  %v259_v43 = vld [vmem:[%s886_s8] sm:$0x3]  ;;  %s744_s8 = smov [#allocation7]  }
  0x36   :  { %v471_v44 = vld [vmem:[%s887_s9] sm:$0x3]  ;;  %v264_v46 = vrot.slane %v259_v43, %v263_v42  ;;  %s509_s9 = sshll.u32 %s744_s8, 4  ;;  %s510_s9 = int_to_ptr.vmem [resolvable:$true] %s509_s9 }
  0x37   :  { %v476_v48 = vrot.slane %v471_v44, %v263_v42  ;;  %s687_s15 = scalar_lea.vmem %s510_s9, 128  ;;  %p692_p3 = scmp.lt.s32.totalorder %s510_s9, %s510_s9 }
  0x38   :  { %488 = vperm.xlu1 %610, %v485_v28   ;;  %p688_p2 = scmp.ne.s32.totalorder %s510_s9, %s687_s15  ;;  %p693_p4 = scmp.lt.s32.totalorder %s687_s15, %s687_s15 }
  0x3a   :  { %570 = vmatpush3.bf16.xpose.msra.mxu0 %v621_v11  ;;  %p694_p5 = por %p693_p4, %p692_p3 }
  0x3b   :  { %588 = vmatpush3.bf16.xpose.msra.mxu1 %v622_v12  ;;  %571 = vmatprep.subr.bf16.mxu0 %v623_v13 }
  0x3c   :  { %589 = vmatprep.subr.bf16.mxu1 %v624_v14  ;;  %p695_p6 = pnand %p694_p5, %p688_p2 }
  0x42   :  { %572 = vmatpush3.bf16.xpose.msra.mxu0 %v625_v15 }
  0x43   :  { %590 = vmatpush3.bf16.xpose.msra.mxu1 %v626_v16  ;;  %573 = vmatprep.subr.bf16.mxu0 %v627_v17 }
  0x44   :  { %591 = vmatprep.subr.bf16.mxu1 %v628_v18 }
  0x4a   :  { %574 = vmatpush3.bf16.xpose.msra.mxu0 %v629_v19 }
  0x4b   :  { %592 = vmatpush3.bf16.xpose.msra.mxu1 %v630_v23  ;;  %575 = vmatprep.subr.bf16.mxu0 %v631_v24 }
  0x4c   :  { %593 = vmatprep.subr.bf16.mxu1 %v632_v26 }
  0x52   :  { %576 = vmatpush3.bf16.xpose.msra.mxu0 %v633_v29 }
  0x53   :  { %594 = vmatpush3.bf16.xpose.msra.mxu1 %v634_v30  ;;  %577 = vmatprep.subr.bf16.mxu0 %v635_v31 }
  0x54   :  { %595 = vmatprep.subr.bf16.mxu1 %v636_v32 }
  0x5a   :  { %578 = vmatpush3.bf16.xpose.msra.mxu0 %v637_v33 }
  0x5b   :  { %596 = vmatpush3.bf16.xpose.msra.mxu1 %v638_v34  ;;  %579 = vmatprep.subr.bf16.mxu0 %v639_v35 }
  0x5c   :  { %597 = vmatprep.subr.bf16.mxu1 %v640_v36 }
  0x62   :  { %580 = vmatpush3.bf16.xpose.msra.mxu0 %v641_v37 }
  0x63   :  { %598 = vmatpush3.bf16.xpose.msra.mxu1 %v642_v38 }
  0x69   :  { %582 = vmatmul.mubr.bf16.vlgmr.msra.gmra.mrb[0].mxu0 %v81_v20 }
  0x6a   :  { %600 = vmatmul.mubr.bf16.vlgmr.msra.gmra.mrb[0].mxu1 %v293_v21 }
  0xb0   :  { %v255_v41 = vpop.permute.xlu0 %254 }
  0xb3   :  { %v277_v45 = vpop.permute.xlu1 %276 }
  0xb4   :  { %v467_v47 = vpop.permute.xlu0 %466 }
  0xb7   :  { %v489_v62 = vpop.permute.xlu1 %488 }
 0x13c   :  { %v244_v49 = vpop.f32.mrb[0].mxu0 }
 0x13d   :  { %v456_v50 = vpop.f32.mrb[0].mxu1  ;;  %v257_v51 = vmul.f32 %v255_v41, %v244_v49  ;;  %v246_v52 = vpop.f32.mrb[1].mxu0 }
 0x13e   :  { %v469_v53 = vmul.f32 %v467_v47, %v456_v50  ;;  %v458_v54 = vpop.f32.mrb[1].mxu1  ;;  %v248_v55 = vpop.f32.mrb[2].mxu0 }
 0x13f   :  { %v271_v56 = vmul.f32 %v264_v46, %v257_v51  ;;  %v460_v57 = vpop.f32.mrb[2].mxu1  ;;  %v249_v58 = vpop.f32.mrb[3].mxu0 }
 0x140   :  { %v483_v60 = vmul.f32 %v476_v48, %v469_v53  ;;  %v461_v61 = vpop.f32.mrb[3].mxu1 }
 0x141   :  { %v279_v63 = vsub.f32 %v271_v56, %v277_v45 }
 0x142   :  { %v491_v0 = vsub.f32 %v483_v60, %v489_v62 }
 0x143   :  { %v281_v1 = vadd.f32 0.5, %v279_v63 }
 0x144   :  { %v493_v2 = vadd.f32 1.0, %v491_v0 }
 0x145   :  { %v283_v3 = vmax.f32 %v281_v1, 0.0 }
 0x146   :  { %v495_v4 = vmax.f32 %v493_v2, 0.0 }
 0x147   :  { %v287_v5 = vsel %vm285_vm0, %v283_v3, 0.0 }
 0x148   :  { %v497_v6 = vsel %vm285_vm0, %v495_v4, 0.0  ;;  %292 = vst [vmem:[#allocation7] sm:$0xff] %v287_v5 }
 0x149   :  { %502 = vst [vmem:[#allocation8] sm:$0xff] %v497_v6 }
 0x14a   :  { %698 = shalt.err (!%p695_p6)
}
 0x14b   :  { %s699_s19 = scalar_lea.hbm %s888_s10, 128 }
 0x14c   :  { %p700_p7 = scmp.ne.s32.totalorder %s888_s10, %s699_s19  ;;  %p703_p8 = scmp.lt.u32.totalorder %s699_s19, %s888_s10 }
 0x14e   :  { %p705_p9 = pnand %p703_p8, %p700_p7 }
 0x150   :  { %708 = shalt.err (!%p705_p9)
}
 0x151   :  { %512 = dma.vmem_to_hbm [thread:$0]  %s510_s9, 128, %s888_s10, [#allocation4]  }
 0x152   :  { %s709_s23 = scalar_lea.vmem %s520_s14, 128  ;;  %p714_p11 = scmp.lt.s32.totalorder %s520_s14, %s520_s14 }
 0x153   :  { %p710_p10 = scmp.ne.s32.totalorder %s520_s14, %s709_s23  ;;  %p715_p12 = scmp.lt.s32.totalorder %s709_s23, %s709_s23 }
 0x155   :  { %p716_p13 = por %p715_p12, %p714_p11 }
 0x157   :  { %p717_p0 = pnand %p716_p13, %p710_p10 }
 0x159   :  { %720 = shalt.err (!%p717_p0)
}
 0x15a   :  { %s721_s26 = scalar_lea.hbm %s889_s11, 128 }
 0x15b   :  { %p722_p1 = scmp.ne.s32.totalorder %s889_s11, %s721_s26  ;;  %p725_p2 = scmp.lt.u32.totalorder %s721_s26, %s889_s11 }
 0x15d   :  { %p727_p3 = pnand %p725_p2, %p722_p1 }
 0x15f   :  { %730 = shalt.err (!%p727_p3)
}
 0x160   :  { %522 = dma.vmem_to_hbm [thread:$0]  %s520_s14, 128, %s889_s11, [#allocation9]  }
 0x161   :  { %735 = dma.done.wait [#allocation4], 128  }
 0x162   :  { %736 = vsyncadd [#allocation4], 4294967168 }
 0x163   :  { %737 = dma.done.wait [#allocation9], 128  }
 0x164   :  { %738 = vsyncadd [#allocation9], 4294967168 }
 0x165   :  { %529 = vsyncpa [#allocation3], 1 }
 0x166   :  { %530 = vsyncpa [#allocation6], 1 }
 0x167   :  { %531 = vsyncpa [#allocation4], 1 }
 0x168   :  { %532 = vsyncpa [#allocation9], 1 }

</bundles_post_ra>
